<compile_context>
chip_gen: v7x
topology: tpu7x:2x2x1
jax: 0.10.0
libtpu: 0.0.40
codegen_flags: <defaults>
</compile_context>

<pallas_src>
import functools

import jax
import jax.numpy as jnp
import numpy as np
from jax.experimental import pallas as pl
from jax.experimental.pallas import tpu as pltpu


_TILE_BYTE_BUDGET = 2 << 20  # ~2 MiB f32 logits working set per grid step


def _pick_tile(C, HW):
    """Spatial lanes per grid step: C*tile*4 ≈ 2 MiB, multiple of 128, ≤ HW."""
    lanes = _TILE_BYTE_BUDGET // (max(C, 1) * 4)
    lanes = max(128, (lanes // 128) * 128)
    return min(HW, lanes)


def _ce_kernel(x_ref, y_ref, out_ref, *, hw_total, tile, masked):
    # x_ref:   (1, C, TILE) logits (native dtype) for sample n, spatial chunk t
    # y_ref:   (1, 1, TILE) integer labels
    # out_ref: (1, 1, 1)    f32 per-sample summed loss (resident across t)
    t = pl.program_id(1)

    x = x_ref[0].astype(jnp.float32)      # (C, TILE)
    y = y_ref[0].astype(jnp.int32)        # (1, TILE)
    C, TILE = x.shape

    # log-sum-exp over the channel (sublane) axis.
    m = jnp.max(x, axis=0, keepdims=True)                   # (1, TILE)
    s = jnp.sum(jnp.exp(x - m), axis=0, keepdims=True)      # (1, TILE)
    lse = m + jnp.log(s)                                    # (1, TILE)

    # x[y_p, p] via select + sublane reduction (no one-hot cast / fmul).
    cls = jax.lax.broadcasted_iota(jnp.int32, (C, 1), 0)    # (C, 1)
    x_sel = jnp.sum(jnp.where(cls == y, x, 0.0),
                    axis=0, keepdims=True)                  # (1, TILE)

    loss = lse - x_sel                                      # (1, TILE)

    if masked:  # only emitted when TILE does not evenly divide H*W
        # Mask BEFORE the lane-sum: out-of-bounds lanes hold undefined data.
        lane = jax.lax.broadcasted_iota(jnp.int32, (1, TILE), 1)
        valid = (lane + t * tile) < hw_total
        loss = jnp.where(valid, loss, 0.0)

    tile_sum = jnp.sum(loss, axis=1, keepdims=True)         # (1, 1)

    @pl.when(t == 0)
    def _():
        out_ref[...] = jnp.zeros_like(out_ref)

    out_ref[...] += tile_sum[None]


def cross_entropy_loss(x, y, *, reduction="mean"):
    """x: [N, C, *spatial] logits (any float dtype); y: [N, *spatial] int labels."""
    N, C = x.shape[0], x.shape[1]
    spatial = x.shape[2:]
    HW = int(np.prod(spatial)) if spatial else 1

    x_flat = x.reshape(N, C, HW)            # keep native dtype: no HBM upcast copy
    y_flat = y.reshape(N, 1, HW)            # widened to int32 inside the kernel

    tile = _pick_tile(C, HW)
    num_tiles = pl.cdiv(HW, tile)
    masked = (HW % tile) != 0

    cost = pl.CostEstimate(
        flops=6 * N * C * HW,
        transcendentals=N * C * HW,
        bytes_accessed=N * C * HW * x.dtype.itemsize
        + N * HW * y.dtype.itemsize
        + N * 4,
    )

    per_sample_sum = pl.pallas_call(
        functools.partial(_ce_kernel, hw_total=HW, tile=tile, masked=masked),
        out_shape=jax.ShapeDtypeStruct((N, 1, 1), jnp.float32),
        grid=(N, num_tiles),
        in_specs=[
            pl.BlockSpec((1, C, tile), lambda n, t: (n, 0, t)),
            pl.BlockSpec((1, 1, tile), lambda n, t: (n, 0, t)),
        ],
        out_specs=pl.BlockSpec((1, 1, 1), lambda n, t: (n, 0, 0)),
        compiler_params=pltpu.CompilerParams(
            dimension_semantics=("parallel", "arbitrary"),
            vmem_limit_bytes=32 * 1024 * 1024,
        ),
        cost_estimate=cost,
    )(x_flat, y_flat)

    total = jnp.sum(per_sample_sum)
    if reduction == "mean":
        return total / (N * HW)
    if reduction == "sum":
        return total
    raise NotImplementedError(f"reduction={reduction!r} not supported")


class CELoss:
    """JAX/Pallas counterpart of the PyTorch CELoss module (forward + running mean)."""

    def __init__(self, reduction="mean", weights=None):
        # TODO(synk): per-class `weight=` and `ignore_index` paths of
        # nn.CrossEntropyLoss are not implemented (module default is weight=None).
        if weights is not None:
            raise NotImplementedError("per-class weights not supported")
        self.reduction = reduction
        self.running_dict = {"loss": 0.0}

    def __call__(self, x, y):
        loss = cross_entropy_loss(x, y, reduction=self.reduction)
        self.accumulate(loss)
        return loss

    def accumulate(self, batch_loss):
        self.running_dict["loss"] += float(batch_loss)   # mirrors .item()

    def get_current_value(self, batch_n):
        return self.running_dict["loss"] / (batch_n + 1)

    def reset(self):
        self.running_dict = {"loss": 0.0}


def _reference(x, y):
    """Pure-JAX reference reproducing nn.CrossEntropyLoss(reduction='mean')."""
    N, C = x.shape[0], x.shape[1]
    xf = x.reshape(N, C, -1).astype(jnp.float32)
    yf = y.reshape(N, -1)
    logp = jax.nn.log_softmax(xf, axis=1)
    nll = -jnp.take_along_axis(logp, yf[:, None, :], axis=1)[:, 0, :]
    return jnp.mean(nll)


if __name__ == "__main__":
    key = jax.random.PRNGKey(0)
    kx, ky = jax.random.split(key)

    # Primary small-shape test (single tile: tile == HW == 256).
    N, C, H, W = 2, 4, 16, 16
    x = jax.random.normal(kx, (N, C, H, W), dtype=jnp.float32)
    y = jax.random.randint(ky, (N, H, W), 0, C, dtype=jnp.int32)

    loss_mod = CELoss(reduction="mean")
    loss = loss_mod(x, y)
    jax.block_until_ready(loss)

    ref = _reference(x, y)
    np.testing.assert_allclose(np.asarray(loss), np.asarray(ref), rtol=1e-5, atol=1e-5)

    print("KERNEL_OK")
</pallas_src>

<mosaic_0001>
module attributes {stable_mosaic.version = 11 : i64} {
  func.func @_ce_kernel(%arg0: i32, %arg1: i32, %arg2: memref<1x4x256xf32, #tpu.memory_space<vmem>>, %arg3: memref<1x1x256xi32, #tpu.memory_space<vmem>>, %arg4: memref<1x1x1xf32, #tpu.memory_space<vmem>>) attributes {dimension_semantics = [#tpu.dimension_semantics<parallel>, #tpu.dimension_semantics<arbitrary>], iteration_bounds = array<i64: 2, 1>, scalar_prefetch = 0 : i64, scratch_operands = 0 : i64, tpu.core_type = #tpu.core_type<tc>, window_params = [{transform_indices = @transform_0, window_bounds = array<i64: 1, 4, 256>}, {transform_indices = @transform_1, window_bounds = array<i64: 1, 1, 256>}, {transform_indices = @transform_2, window_bounds = array<i64: 1, 1, 1>}]} {
    %c0 = arith.constant 0 : index
    %c0_0 = arith.constant 0 : index
    %c0_1 = arith.constant 0 : index
    %0 = vector.load %arg2[%c0, %c0_0, %c0_1] : memref<1x4x256xf32, #tpu.memory_space<vmem>>, vector<1x4x256xf32>
    %1 = vector.shape_cast %0 : vector<1x4x256xf32> to vector<4x256xf32>
    %c0_2 = arith.constant 0 : index
    %c0_3 = arith.constant 0 : index
    %c0_4 = arith.constant 0 : index
    %2 = vector.load %arg3[%c0_2, %c0_3, %c0_4] : memref<1x1x256xi32, #tpu.memory_space<vmem>>, vector<1x1x256xi32>
    %3 = vector.shape_cast %2 : vector<1x1x256xi32> to vector<1x256xi32>
    %cst = arith.constant dense<0xFF800000> : vector<256xf32>
    %4 = vector.multi_reduction <maximumf>, %1, %cst [0] : vector<4x256xf32> to vector<256xf32>
    %5 = vector.shape_cast %4 : vector<256xf32> to vector<1x256xf32>
    %6 = vector.broadcast %5 : vector<1x256xf32> to vector<4x256xf32>
    %7 = arith.subf %1, %6 : vector<4x256xf32>
    %8 = math.exp %7 : vector<4x256xf32>
    %cst_5 = arith.constant dense<0.000000e+00> : vector<256xf32>
    %9 = vector.multi_reduction <add>, %8, %cst_5 [0] : vector<4x256xf32> to vector<256xf32>
    %10 = vector.shape_cast %9 : vector<256xf32> to vector<1x256xf32>
    %11 = math.log %10 : vector<1x256xf32>
    %12 = arith.addf %5, %11 : vector<1x256xf32>
    %13 = tpu.iota {dimensions = array<i32: 0>} : vector<4x1xi32>
    %14 = vector.broadcast %13 : vector<4x1xi32> to vector<4x256xi32>
    %15 = vector.broadcast %3 : vector<1x256xi32> to vector<4x256xi32>
    %16 = arith.cmpi eq, %14, %15 : vector<4x256xi32>
    %cst_6 = arith.constant 0.000000e+00 : f32
    %17 = vector.broadcast %cst_6 : f32 to vector<4x256xf32>
    %18 = arith.select %16, %1, %17 : vector<4x256xi1>, vector<4x256xf32>
    %cst_7 = arith.constant dense<0.000000e+00> : vector<256xf32>
    %19 = vector.multi_reduction <add>, %18, %cst_7 [0] : vector<4x256xf32> to vector<256xf32>
    %20 = vector.shape_cast %19 : vector<256xf32> to vector<1x256xf32>
    %21 = arith.subf %12, %20 : vector<1x256xf32>
    %cst_8 = arith.constant dense<0.000000e+00> : vector<1xf32>
    %22 = vector.multi_reduction <add>, %21, %cst_8 [1] : vector<1x256xf32> to vector<1xf32>
    %23 = vector.shape_cast %22 : vector<1xf32> to vector<1x1xf32>
    %c0_i32 = arith.constant 0 : i32
    %24 = arith.cmpi eq, %arg1, %c0_i32 : i32
    %25 = arith.extui %24 : i1 to i32
    %c0_i32_9 = arith.constant 0 : i32
    %26 = arith.cmpi ne, %25, %c0_i32_9 : i32
    scf.if %26 {
      %cst_16 = arith.constant 0.000000e+00 : f32
      %31 = vector.broadcast %cst_16 : f32 to vector<1x1x1xf32>
      %c0_17 = arith.constant 0 : index
      %c0_18 = arith.constant 0 : index
      %c0_19 = arith.constant 0 : index
      %32 = vector.load %arg4[%c0_17, %c0_18, %c0_19] : memref<1x1x1xf32, #tpu.memory_space<vmem>>, vector<1x1x1xf32>
      tpu.vector_store %arg4[%c0_17, %c0_18, %c0_19], %31 {strides = array<i32>} : memref<1x1x1xf32, #tpu.memory_space<vmem>>, vector<1x1x1xf32>,
    } else {
    }
    %c0_10 = arith.constant 0 : index
    %c0_11 = arith.constant 0 : index
    %c0_12 = arith.constant 0 : index
    %27 = vector.load %arg4[%c0_10, %c0_11, %c0_12] : memref<1x1x1xf32, #tpu.memory_space<vmem>>, vector<1x1x1xf32>
    %28 = vector.shape_cast %23 : vector<1x1xf32> to vector<1x1x1xf32>
    %29 = arith.addf %27, %28 : vector<1x1x1xf32>
    %c0_13 = arith.constant 0 : index
    %c0_14 = arith.constant 0 : index
    %c0_15 = arith.constant 0 : index
    %30 = vector.load %arg4[%c0_13, %c0_14, %c0_15] : memref<1x1x1xf32, #tpu.memory_space<vmem>>, vector<1x1x1xf32>
    tpu.vector_store %arg4[%c0_13, %c0_14, %c0_15], %29 {strides = array<i32>} : memref<1x1x1xf32, #tpu.memory_space<vmem>>, vector<1x1x1xf32>,
    return
  }
  func.func @transform_0(%arg0: i32, %arg1: i32) -> (i32, i32, i32) {
    %c0_i32 = arith.constant 0 : i32
    %c0_i32_0 = arith.constant 0 : i32
    return %arg0, %c0_i32, %arg1 : i32, i32, i32
  }
  func.func @transform_1(%arg0: i32, %arg1: i32) -> (i32, i32, i32) {
    %c0_i32 = arith.constant 0 : i32
    %c0_i32_0 = arith.constant 0 : i32
    return %arg0, %c0_i32, %arg1 : i32, i32, i32
  }
  func.func @transform_2(%arg0: i32, %arg1: i32) -> (i32, i32, i32) {
    %c0_i32 = arith.constant 0 : i32
    %c0_i32_0 = arith.constant 0 : i32
    %c0_i32_1 = arith.constant 0 : i32
    return %arg0, %c0_i32, %c0_i32_0 : i32, i32, i32
  }
}

</mosaic_0001>

<bundles_post_ra>
// kernel: tpu_custom_call.1
= control target key start
LH: loop header
LB: loop body
LE: loop exit
PB: predicated region body
PF: predicated region fallthrough
CT: control target
= control target key end

     0   :  { %7 = vsyncpa [#allocation3], 0  ;;  %s798_s0 = inlined_call_operand.hbm [shape: f32[2,4,256], index: 0, kind: input, shape index: {}]   ;;  %s799_s1 = inlined_call_operand.hbm [shape: s32[2,1,256], index: 1, kind: input, shape index: {}]   ;;  %s800_s2 = inlined_call_operand.vmem [shape: f32[2,1,1], index: 2, kind: output, shape index: {}]  }
   0x1   :  { %9 = vsyncpa [#allocation3 + $0x1], 0 }
   0x2   :  { %10 = vsyncpa [#allocation5], 0 }
   0x3   :  { %12 = vsyncpa [#allocation5 + $0x1], 0  ;;  %s626_s9 = smov 0   ;;  %s628_s10 = smov 0  }
   0x4   :  { %s630_s11 = smov 0   ;;  %s632_s12 = smov 0  }
   0x5   :  { %s634_s13 = smov 0   ;;  %s636_s14 = smov 0  }
   0x6 LB: > { %s407_s15 = sadd.s32 4294967295, %s606_s14   ;;  %s30_s16 = sadd.s32 1, %s602_s13  ;;  %s606_s14 = sphi %s636_s14, %s18_s14   ;;  %s602_s13 = sphi %s634_s13, %s814_s13   ;;  %s598_s12 = sphi %s632_s12, %s813_s12   ;;  %s594_s11 = sphi %s630_s11, %s812_s11   ;;  %s590_s10 = sphi %s628_s10, %s811_s10   ;;  %s586_s9 = sphi %s626_s9, %s810_s9  }
   0x7   : > { %p32_p0 = scmp.ge.s32.totalorder %s30_s16, 2  ;;  %s39_s17 = sadd.s32 1, %s594_s11 }
   0x8   : > { %p46_p1 = scmp.ne.s32.totalorder %s594_s11, %s590_s10  ;;  %p47_p2 = scmp.eq.s32.totalorder %s606_s14, 0 }
   0x9   : > { %s816_s16 = smov (%p32_p0, %s30_s16), 0  ;;  %p52_p4 = scmp.ne.s32.totalorder %s590_s10, %s586_s9 }
   0xa   : > { %p662_p3 = por %p47_p2, %p46_p1  ;;  %s34_s19 = ssub.s32 %s602_s13, %s816_s16 }
   0xb   : > { %p53_p5 = scmp.eq.s32.totalorder %s407_s15, 0  ;;  %p37_p6 = scmp.eq.s32.totalorder %s34_s19, 0 }
   0xc   : > { %p435_p8 = scmp.lt.s32.totalorder %s606_s14, 2  ;;  %s678_s22 = sand.u32 1, %s594_s11  }
   0xd   : > { %p669_p7 = por %p53_p5, %p52_p4  ;;  %s422_s23 = sshll.u32 %s602_s13, 7 }
   0xe   : > { %s675_s21 = scalar_select %p37_p6, %s594_s11, %s39_s17  }
   0xf   : > { %s803_s20 = scalar_select %p669_p7, 1, 0 }
  0x10   : > { %s411_s24 = sshll.u32 %s678_s22, 3  ;;  %s685_s27 = scalar_lea.hbm %s798_s0, %s422_s23 }
  0x11   : > { %s134_s28 = scalar_lea.vmem [#allocation2], %s411_s24  ;;  %p689_p9 = pnand %p435_p8, %p662_p3 }
  0x12   : > { %s144_s29 = sshll.u32 %s134_s28, 4  ;;  %s131_s3 = scalar_lea.sflag [#allocation3], %s678_s22  ;;  %s693_s29 = int_to_ptr.vmem [resolvable:$true] %s144_s29 }
  0x13   : > { %s492_s4 = scalar_lea.hbm %s685_s27, 128  ;;  %p494_p13 = pneg %p689_p9 }
  0x14   : > { %p493_p12 = scmp.ne.s32.totalorder %s685_s27, %s492_s4  ;;  %s497_s7 = scalar_lea.hbm %s798_s0, 256 }
  0x15   : > { %p498_p2 = scmp.lt.u32.totalorder %s685_s27, %s798_s0  ;;  %p499_p3 = scmp.lt.u32.totalorder %s497_s7, %s492_s4 }
  0x16   : > { %p495_p0 = pnand %p494_p13, %p493_p12  ;;  %p501_p5 = scmp.lt.u32.totalorder %s492_s4, %s685_s27 }
  0x17   : > { %p500_p4 = por %p499_p3, %p498_p2 }
  0x18   : > { %p496_p1 = pneg %p495_p0 }
  0x19   : > { %p502_p6 = por %p501_p5, %p500_p4 }
  0x1b   : > { %p503_p8 = pnand %p502_p6, %p496_p1 }
  0x1d   : > { %506 = shalt.err (!%p503_p8)
}
  0x1e   : > { %s507_s15 = scalar_lea.vmem %s693_s29, 128  ;;  %s608_s17 = smov [#allocation2]  }
  0x1f   : > { %p508_p12 = scmp.ne.s32.totalorder %s693_s29, %s507_s15  ;;  %s512_s18 = sshll.u32 %s608_s17, 4  ;;  %s513_s18 = int_to_ptr.vmem [resolvable:$false] %s512_s18 }
  0x20   : > { %s514_s19 = scalar_lea.vmem %s513_s18, 256  ;;  %p515_p11 = scmp.lt.s32.totalorder %s693_s29, %s513_s18 }
  0x21   : > { %p510_p0 = pnand %p508_p12, %p494_p13  ;;  %p516_p2 = scmp.lt.s32.totalorder %s514_s19, %s507_s15 }
  0x23   : > { %p511_p10 = pneg %p510_p0  ;;  %p517_p3 = por %p516_p2, %p515_p11 }
  0x25   : > { %p518_p4 = pnand %p517_p3, %p511_p10 }
  0x27   : > { %521 = shalt.err (!%p518_p4)
}
  0x28   : > { %431 = dma.hbm_to_vmem [thread:$0]  (!%p689_p9), %s685_s27, 128, %s693_s29, %s131_s3  }
  0x29   : > { %p805_p1 = scmp.lt.s32.totalorder %s606_s14, 3  ;;  %p806_p5 = scmp.ge.s32.totalorder %s606_s14, 1 }
  0x2a   : > { %s414_s24 = sshll.u32 %s678_s22, 1  ;;  %s423_s25 = sshll.u32 %s602_s13, 5 }
  0x2b   : > { %p727_p6 = pnand %p806_p5, %p805_p1  ;;  %s736_s4 = scalar_lea.hbm %s799_s1, %s423_s25 }
  0x2c   : > { %s155_s5 = scalar_lea.vmem [#allocation4], %s414_s24  ;;  %s152_s27 = scalar_lea.sflag [#allocation5], %s678_s22 }
  0x2d   : > { %s807_s23 = scalar_select %p727_p6, 1, 0 }
  0x2e   : > { %s165_s6 = sshll.u32 %s155_s5, 4  ;;  %s522_s29 = scalar_lea.hbm %s736_s4, 32  ;;  %s166_s6 = int_to_ptr.vmem [resolvable:$true] %s165_s6 }
  0x2f   : > { %p523_p10 = scmp.ne.s32.totalorder %s736_s4, %s522_s29  ;;  %s527_s8 = scalar_lea.hbm %s799_s1, 64 }
  0x30   : > { %p528_p12 = scmp.lt.u32.totalorder %s736_s4, %s799_s1  ;;  %p529_p0 = scmp.lt.u32.totalorder %s527_s8, %s522_s29 }
  0x31   : > { %p525_p11 = pnand %p523_p10, %p494_p13  ;;  %p531_p3 = scmp.lt.u32.totalorder %s522_s29, %s736_s4 }
  0x32   : > { %p530_p2 = por %p529_p0, %p528_p12 }
  0x33   : > { %p526_p8 = pneg %p525_p11 }
  0x34   : > { %p532_p4 = por %p531_p3, %p530_p2 }
  0x36   : > { %p533_p1 = pnand %p532_p4, %p526_p8 }
  0x38   : > { %536 = shalt.err (!%p533_p1)
}
  0x39   : > { %s537_s22 = scalar_lea.vmem %s166_s6, 32  ;;  %s609_s17 = smov [#allocation4]  }
  0x3a   : > { %p538_p5 = scmp.ne.s32.totalorder %s166_s6, %s537_s22  ;;  %s542_s18 = sshll.u32 %s609_s17, 4  ;;  %s543_s18 = int_to_ptr.vmem [resolvable:$false] %s542_s18 }
  0x3b   : > { %s544_s19 = scalar_lea.vmem %s543_s18, 64  ;;  %p545_p7 = scmp.lt.s32.totalorder %s166_s6, %s543_s18 }
  0x3c   : > { %p540_p10 = pnand %p538_p5, %p494_p13  ;;  %p546_p6 = scmp.lt.s32.totalorder %s544_s19, %s537_s22 }
  0x3e   : > { %p541_p11 = pneg %p540_p10  ;;  %p547_p0 = por %p546_p6, %p545_p7 }
  0x40   : > { %p548_p12 = pnand %p547_p0, %p541_p11 }
  0x42   : > { %551 = shalt.err (!%p548_p12)
}
  0x43   : > { %434 = dma.hbm_to_vmem [thread:$0]  (!%p689_p9), %s736_s4, 32, %s166_s6, %s152_s27  }
  0x44   : > { %p808_p8 = scmp.ne.s32.totalorder %s807_s23, 0 }
  0x45   : > { %s176_s24 = sand.u32 (!%p808_p8), 1, %s590_s10   ;;  %p809_p13 = scmp.ne.s32.totalorder (!%p808_p8), %s803_s20, 0 }
  0x46   : > { %174 = sbr.rel (%p808_p8) target bundleno = 293 (0x125), region = 28  ;;  %s418_s25 = sshll.u32 (!%p808_p8), %s176_s24, 3 }
  0x47   : > { %s177_s26 = scalar_lea.sflag (!%p808_p8), [#allocation3], %s176_s24  ;;  %s180_s28 = scalar_lea.vmem (!%p808_p8), [#allocation2], %s418_s25 }
  0x4d   : > { %577 = dma.done.wait (%p809_p13), %s177_s26, 128  }
  0x4e   : > { %579 = vsyncadd (%p809_p13), %s177_s26, 4294967168  ;;  %s419_s5 = sshll.u32 %s176_s24, 1  ;;  %s186_s29 = scalar_lea.sflag [#allocation5], %s176_s24 }
  0x4f   : > { %s189_s30 = scalar_lea.vmem [#allocation4], %s419_s5 }
  0x50   : > { %581 = dma.done.wait (%p809_p13), %s186_s29, 32  }
  0x51   : > { %583 = vsyncadd (%p809_p13), %s186_s29, 4294967264  ;;  %vm223_vm0 = vcmask 1043456   ;;  %v218_v0 = vld [vmem:[%s180_s28] sm:$0xff]  ;;  %v268_v15 = vlaneseq  ;;  %v219_v22 = vld [vmem:[%s189_s30] sm:$0x3]  ;;  %p215_p7 = scmp.lt.s32.totalorder %s598_s12, 1 }
  0x52   : > { %v221_v1 = vcombine.high %v218_v0, %v218_v0  ;;  %v224_v2 = vsel %vm223_vm0, %v218_v0, -inf  ;;  %vm305_vm3 = vcmask 0  }
  0x53   : > { %v225_v3 = vrot.slane %v224_v2, 4  ;;  %v269_v18 = vshrl.u32 %v268_v15, 7  ;;  %s818_s12 = smov (!%p215_p7, %s598_s12), 1 }
  0x54   : > { %v231_v4 = vsel %vm223_vm0, %v221_v1, -inf  ;;  %s217_s4 = scalar_lea.vmem %s800_s2, %s818_s12 }
  0x55   : > { %v226_v5 = vmax.f32 %v224_v2, %v225_v3  ;;  %v232_v6 = vrot.slane %v231_v4, 4  ;;  %v272_v21 = vsub.s32 0, %v269_v18  ;;  %v276_v23 = vsub.s32 1, %v269_v18 }
  0x56   : > { %v610_v3 = vmov 0.0  }
  0x57   : > { %v227_v7 = vrot.slane %v226_v5, 2  ;;  %v233_v8 = vmax.f32 %v231_v4, %v232_v6  ;;  %v273_v24 = vrot.slane %v219_v22, %v272_v21  ;;  %v277_v25 = vrot.slane %v219_v22, %v276_v23  ;;  %306 = vst.msk [vmem:[%s217_s4] sm:$0x1] %vm305_vm3, %v610_v3 }
  0x59   : > { %v228_v9 = vmax.f32 %v226_v5, %v227_v7  ;;  %v234_v10 = vrot.slane %v233_v8, 2  ;;  %vm278_vm1 = vcmp.eq.s32.totalorder %v269_v18, %v273_v24  ;;  %vm279_vm2 = vcmp.eq.s32.totalorder %v269_v18, %v277_v25 }
  0x5a   : > { %v280_v26 = vsel %vm278_vm1, %v218_v0, 0.0  ;;  %v281_v30 = vsel %vm279_vm2, %v221_v1, 0.0 }
  0x5b   : > { %v229_v11 = vrot.slane %v228_v9, 1  ;;  %v235_v12 = vmax.f32 %v233_v8, %v234_v10  ;;  %v282_v32 = vsel %vm223_vm0, %v280_v26, 0.0  ;;  %v289_v36 = vsel %vm223_vm0, %v281_v30, 0.0 }
  0x5c   : > { %v283_v37 = vrot.slane %v282_v32, 4  ;;  %v290_v40 = vrot.slane %v289_v36, 4 }
  0x5d   : > { %v230_v13 = vmax.f32 %v228_v9, %v229_v11  ;;  %v236_v14 = vrot.slane %v235_v12, 1 }
  0x5e   : > { %v284_v43 = vadd.f32 %v283_v37, %v282_v32  ;;  %v291_v46 = vadd.f32 %v290_v40, %v289_v36  ;;  %v307_v4 = vld [vmem:[%s217_s4] sm:$0x1] }
  0x5f   : > { %v237_v16 = vmax.f32 %v235_v12, %v236_v14 }
  0x60   : > { %v285_v49 = vrot.slane %v284_v43, 2  ;;  %v292_v51 = vrot.slane %v291_v46, 2 }
  0x61   : > { %v240_v17 = vcombine.low %v230_v13, %v237_v16 }
  0x62   : > { %v286_v52 = vadd.f32 %v285_v49, %v284_v43  ;;  %v293_v53 = vadd.f32 %v292_v51, %v291_v46 }
  0x63   : > { %v242_v19 = vsub.f32 %v218_v0, %v240_v17 }
  0x64   : > { %v287_v54 = vrot.slane %v286_v52, 1  ;;  %v294_v55 = vrot.slane %v293_v53, 1 }
  0x65   : > { %v243_v20 = vmul.f32 1.442695, %v242_v19 }
  0x66   : > { %v288_v58 = vadd.f32 %v287_v54, %v286_v52  ;;  %v295_v62 = vadd.f32 %v294_v55, %v293_v53 }
  0x67   : > { %486 = vpow2.f32 %v243_v20 }
  0x71   : > { %v487_v27 = vpop.eup %486 }
  0x72   : > { %v246_v28 = vcombine.high %v487_v27, %v487_v27  ;;  %v248_v29 = vsel %vm223_vm0, %v487_v27, 0.0 }
  0x73   : > { %v249_v31 = vrot.slane %v248_v29, 4 }
  0x74   : > { %v255_v33 = vsel %vm223_vm0, %v246_v28, 0.0 }
  0x75   : > { %v250_v34 = vadd.f32 %v249_v31, %v248_v29  ;;  %v256_v35 = vrot.slane %v255_v33, 4 }
  0x77   : > { %v251_v38 = vrot.slane %v250_v34, 2  ;;  %v257_v39 = vadd.f32 %v256_v35, %v255_v33 }
  0x79   : > { %v252_v41 = vadd.f32 %v251_v38, %v250_v34  ;;  %v258_v42 = vrot.slane %v257_v39, 2 }
  0x7b   : > { %v253_v44 = vrot.slane %v252_v41, 1  ;;  %v259_v45 = vadd.f32 %v258_v42, %v257_v39 }
  0x7d   : > { %v254_v47 = vadd.f32 %v253_v44, %v252_v41  ;;  %v260_v48 = vrot.slane %v259_v45, 1 }
  0x7f   : > { %v261_v50 = vadd.f32 %v260_v48, %v259_v45  ;;  %488 = vlog2.f32 %v254_v47 }
  0x81   : > { %490 = vlog2.f32 %v261_v50 }
  0x89   : > { %v489_v56 = vpop.eup %488 }
  0x8a   : > { %v263_v57 = vmul.f32 0.6931472, %v489_v56 }
  0x8b   : > { %v491_v59 = vpop.eup %490 }
  0x8c   : > { %v265_v60 = vmul.f32 0.6931472, %v491_v59  ;;  %v266_v61 = vadd.f32 %v263_v57, %v230_v13 }
  0x8e   : > { %v267_v63 = vadd.f32 %v265_v60, %v237_v16  ;;  %v296_v0 = vsub.f32 %v266_v61, %v288_v58 }
  0x90   : > { %v297_v1 = vsub.f32 %v267_v63, %v295_v62 }
  0x92   : > { %v298_v2 = vadd.f32 %v297_v1, %v296_v0 }
  0x94   : > { %299 = vadd.xlane.f32.xlu0 %v298_v2 }
 0x121   : > { %v300_v5 = vpop.xlane.xlu0 %299 }
 0x122   : > { %v308_v6 = vadd.f32 %v307_v4, %v300_v5 }
 0x124   : > { %310 = vst.msk [vmem:[%s217_s4] sm:$0x1] %vm305_vm3, %v308_v6 }
 0x125 PF: > { %s18_s14 = sadd.s32 1, %s606_s14   ;;  %s810_s9 = smov %s590_s10 }
 0x126   : > { %p15_p9 = scmp.ge.s32.totalorder %s18_s14, 4   ;;  %s811_s10 = smov %s594_s11 }
 0x127   : > { %s812_s11 = smov %s675_s21  ;;  %s813_s12 = smov %s602_s13 }
 0x128   : > { %s814_s13 = smov %s816_s16  ;;  %17 = sbr.rel (!%p15_p9) target bundleno = 6 (0x6), region = 85 }
 0x12f   :  { %328 = vsyncpa [#allocation3], 1 }
 0x130   :  { %330 = vsyncpa [#allocation3 + $0x1], 1 }
 0x131   :  { %331 = vsyncpa [#allocation5], 1 }
 0x132   :  { %333 = vsyncpa [#allocation5 + $0x1], 1 }

</bundles_post_ra>
